<compile_context>
chip_gen: v7x
topology: tpu7x:2x2x1
jax: 0.10.0
libtpu: 0.0.40
codegen_flags: <defaults>
</compile_context>

<pallas_src>
import math

import jax
import jax.numpy as jnp
from jax.experimental import pallas as pl
from jax.experimental.pallas import tpu as pltpu


# ------------------------------- Pallas kernel -------------------------------

def _pe_add_kernel(x_ref, pe_ref, o_ref):
    # x_ref: (TB, TL, D), pe_ref: (TL, D).  The PE tile broadcasts over the
    # batch tile (leading dim) — a cheap vreg replication, no XLU traffic.
    o_ref[...] = x_ref[...] + pe_ref[...]


def _choose_tiles(B, L, D, itemsize, target_bytes=2 * 1024 * 1024):
    """Pick (TB, TL).  Lane axis = full D (always a legal block dim); TL is a
    multiple of 8 or equals L.  Blocks are capped near `target_bytes` so
    double-buffered in/out tiles stay far below the v7x 64 MiB physical /
    v5e 16 MiB scoped VMEM budgets while still being large enough to hit the
    HBM-bandwidth roofline."""
    if L <= 8:
        tl = L
    else:
        row_bytes = max(D * itemsize, 1)
        max_tl = max(8, (target_bytes // row_bytes) // 8 * 8)
        tl = min(512, max_tl)
        if tl >= L:
            tl = L                      # full dim: always legal
    slab_bytes = max(tl * D * itemsize, 1)
    tb = max(1, min(B, target_bytes // slab_bytes))
    return tb, tl


def pe_add(x, pe):
    """out[b, l, d] = x[b, l, d] + pe[l, d]   (eval-mode PositionalEncoding)."""
    B, L, D = x.shape
    itemsize = jnp.dtype(x.dtype).itemsize
    tb, tl = _choose_tiles(B, L, D, itemsize)
    # Batch innermost: the PE block index (l, 0) is constant across it, so the
    # PE tile is fetched once per L-tile, not once per (L-tile, B-tile).
    grid = (pl.cdiv(L, tl), pl.cdiv(B, tb))

    cost = pl.CostEstimate(
        flops=B * L * D,
        transcendentals=0,
        bytes_accessed=2 * B * L * D * itemsize + L * D * itemsize)

    return pl.pallas_call(
        _pe_add_kernel,
        out_shape=jax.ShapeDtypeStruct((B, L, D), x.dtype),
        grid=grid,
        in_specs=[
            pl.BlockSpec((tb, tl, D), lambda l, b: (b, l, 0)),
            pl.BlockSpec((tl, D), lambda l, b: (l, 0)),
        ],
        out_specs=pl.BlockSpec((tb, tl, D), lambda l, b: (b, l, 0)),
        compiler_params=pltpu.CompilerParams(
            dimension_semantics=("parallel", "parallel")),
        cost_estimate=cost,
    )(x, pe)


# ------------------------------ module wrapper --------------------------------

def make_pe_table(d_model, max_len=5000):
    """The fixed sin/cos buffer from PositionalEncoding.__init__: (max_len, d_model)."""
    position = jnp.arange(max_len, dtype=jnp.float32)[:, None]
    div_term = jnp.exp(jnp.arange(0, d_model, 2, dtype=jnp.float32)
                       * (-math.log(10000.0) / d_model))
    pe = jnp.zeros((max_len, d_model), jnp.float32)
    pe = pe.at[:, 0::2].set(jnp.sin(position * div_term))
    pe = pe.at[:, 1::2].set(jnp.cos(position * div_term))
    return pe


def positional_encoding(x, pe_table):
    """x: (B, L, D) with D == d_model and L <= max_len.

    Reproduces `x + self.pe[:, :x.size(1)]` followed by eval-mode dropout
    (identity).
    """
    B, L, D = x.shape
    pe = jax.lax.slice(pe_table, (0, 0), (L, D)).astype(x.dtype)
    # TODO(synk): dropout is modeled in eval mode only (identity).
    return pe_add(x, pe)


# ----------------------------------- main -------------------------------------

if __name__ == "__main__":
    # Lane-dense demo shape: d_model = 128 (full 128-lane stores), small B, L.
    D_MODEL, B, L = 128, 2, 16
    pe_table = make_pe_table(D_MODEL, max_len=5000)
    x = jax.random.normal(jax.random.PRNGKey(0), (B, L, D_MODEL), jnp.float32)

    fwd = jax.jit(positional_encoding)
    out = fwd(x, pe_table)
    jax.block_until_ready(out)

    ref = x + pe_table[None, :L, :]
    assert out.shape == (B, L, D_MODEL), out.shape
    assert bool(jnp.all(jnp.isfinite(out)))
    assert bool(jnp.allclose(out, ref, atol=1e-6, rtol=1e-6))

    # Second shape: d_model < 128 and an odd sequence length — exercises the
    # full-D / full-L block path (no reshapes, no relayouts, still one kernel).
    D2, B2, L2 = 64, 3, 20
    pe_table2 = make_pe_table(D2, max_len=5000)
    x2 = jax.random.normal(jax.random.PRNGKey(1), (B2, L2, D2), jnp.float32)
    out2 = jax.jit(positional_encoding)(x2, pe_table2)
    jax.block_until_ready(out2)
    assert bool(jnp.allclose(out2, x2 + pe_table2[None, :L2, :],
                             atol=1e-6, rtol=1e-6))

    print("KERNEL_OK")
</pallas_src>

<mosaic_0001>
module attributes {stable_mosaic.version = 11 : i64} {
  func.func @_pe_add_kernel(%arg0: i32, %arg1: i32, %arg2: memref<2x16x128xf32, #tpu.memory_space<vmem>>, %arg3: memref<16x128xf32, #tpu.memory_space<vmem>>, %arg4: memref<2x16x128xf32, #tpu.memory_space<vmem>>) attributes {dimension_semantics = [#tpu.dimension_semantics<parallel>, #tpu.dimension_semantics<parallel>], iteration_bounds = array<i64: 1, 1>, scalar_prefetch = 0 : i64, scratch_operands = 0 : i64, tpu.core_type = #tpu.core_type<tc>, window_params = [{transform_indices = @transform_0, window_bounds = array<i64: 2, 16, 128>}, {transform_indices = @transform_1, window_bounds = array<i64: 16, 128>}, {transform_indices = @transform_2, window_bounds = array<i64: 2, 16, 128>}]} {
    %c0 = arith.constant 0 : index
    %c0_0 = arith.constant 0 : index
    %c0_1 = arith.constant 0 : index
    %0 = vector.load %arg2[%c0, %c0_0, %c0_1] : memref<2x16x128xf32, #tpu.memory_space<vmem>>, vector<2x16x128xf32>
    %c0_2 = arith.constant 0 : index
    %c0_3 = arith.constant 0 : index
    %1 = vector.load %arg3[%c0_2, %c0_3] : memref<16x128xf32, #tpu.memory_space<vmem>>, vector<16x128xf32>
    %2 = vector.shape_cast %1 : vector<16x128xf32> to vector<1x16x128xf32>
    %3 = vector.broadcast %2 : vector<1x16x128xf32> to vector<2x16x128xf32>
    %4 = arith.addf %0, %3 : vector<2x16x128xf32>
    %c0_4 = arith.constant 0 : index
    %c0_5 = arith.constant 0 : index
    %c0_6 = arith.constant 0 : index
    %5 = vector.load %arg4[%c0_4, %c0_5, %c0_6] : memref<2x16x128xf32, #tpu.memory_space<vmem>>, vector<2x16x128xf32>
    tpu.vector_store %arg4[%c0_4, %c0_5, %c0_6], %4 {strides = array<i32>} : memref<2x16x128xf32, #tpu.memory_space<vmem>>, vector<2x16x128xf32>,
    return
  }
  func.func @transform_0(%arg0: i32, %arg1: i32) -> (i32, i32, i32) {
    %c0_i32 = arith.constant 0 : i32
    %c0_i32_0 = arith.constant 0 : i32
    return %arg1, %arg0, %c0_i32 : i32, i32, i32
  }
  func.func @transform_1(%arg0: i32, %arg1: i32) -> (i32, i32) {
    %c0_i32 = arith.constant 0 : i32
    %c0_i32_0 = arith.constant 0 : i32
    return %arg0, %c0_i32 : i32, i32
  }
  func.func @transform_2(%arg0: i32, %arg1: i32) -> (i32, i32, i32) {
    %c0_i32 = arith.constant 0 : i32
    %c0_i32_0 = arith.constant 0 : i32
    return %arg1, %arg0, %c0_i32 : i32, i32, i32
  }
}

</mosaic_0001>

<bundles_post_ra>
// kernel: positional_encoding.1
= control target key start
LH: loop header
LB: loop body
LE: loop exit
PB: predicated region body
PF: predicated region fallthrough
CT: control target
= control target key end

     0   :  { %7 = vsyncpa [#allocation3], 0  ;;  %s164_s0 = inlined_call_operand.hbm [shape: f32[2,16,128], index: 0, kind: input, shape index: {}]   ;;  %s165_s1 = inlined_call_operand.vmem [shape: f32[16,128], index: 1, kind: input, shape index: {}]   ;;  %s166_s2 = inlined_call_operand.hbm [shape: f32[2,16,128], index: 2, kind: output, shape index: {}]  }
   0x1   :  { %8 = vsyncpa [#allocation4], 0  ;;  %s109_s9 = smov [#allocation2]   ;;  %s61_s13 = scalar_lea.hbm %s164_s0, 512 }
   0x2   :  { %s14_s10 = sshll.u32 %s109_s9, 4  ;;  %p62_p0 = scmp.ne.s32.totalorder %s164_s0, %s61_s13  ;;  %s15_s10 = int_to_ptr.vmem [resolvable:$true] %s14_s10 }
   0x3   :  { %p65_p1 = scmp.lt.u32.totalorder %s61_s13, %s164_s0 }
   0x5   :  { %p67_p2 = pnand %p65_p1, %p62_p0 }
   0x7   :  { %70 = shalt.err (!%p67_p2)
}
   0x8   :  { %s71_s18 = scalar_lea.vmem %s15_s10, 512  ;;  %p76_p4 = scmp.lt.s32.totalorder %s15_s10, %s15_s10 }
   0x9   :  { %p72_p3 = scmp.ne.s32.totalorder %s15_s10, %s71_s18  ;;  %p77_p5 = scmp.lt.s32.totalorder %s71_s18, %s71_s18 }
   0xb   :  { %p78_p6 = por %p77_p5, %p76_p4 }
   0xd   :  { %p79_p7 = pnand %p78_p6, %p72_p3 }
   0xf   :  { %82 = shalt.err (!%p79_p7)
}
  0x10   :  { %s110_s19 = smov 128   ;;  %s111_s20 = smov 8  }
  0x11   :  { %20 = dma.hbm_to_vmem [thread:$0]  %s164_s0, 512, %s15_s10, [#allocation3], %s110_s19, %s110_s19, %s111_s20  }
  0x12   :  { %105 = dma.done.wait [#allocation3], 512  }
  0x13   :  { %106 = vsyncadd [#allocation3], 4294966784  ;;  %s112_s23 = smov [#allocation5]   ;;  %v26_v0 = vld [vmem:[#allocation2] sm:$0xff]  ;;  %v27_v2 = vld [vmem:[#allocation2 + $0x8] sm:$0xff] }
  0x14   :  { %s45_s24 = sshll.u32 %s112_s23, 4  ;;  %v30_v1 = vld [vmem:[%s165_s1] sm:$0xff]  ;;  %v31_v4 = vld [vmem:[%s165_s1 + $0x8] sm:$0xff]  ;;  %v28_v5 = vld [vmem:[#allocation2 + $0x10] sm:$0xff]  ;;  %s46_s24 = int_to_ptr.vmem [resolvable:$true] %s45_s24 }
  0x15   :  { %v32_v3 = vadd.f32 %v30_v1, %v26_v0  ;;  %v29_v6 = vld [vmem:[#allocation2 + $0x18] sm:$0xff]  ;;  %v33_v7 = vadd.f32 %v31_v4, %v27_v2  ;;  %v34_v8 = vadd.f32 %v30_v1, %v28_v5  ;;  %s83_s0 = scalar_lea.vmem %s46_s24, 512  ;;  %p88_p9 = scmp.lt.s32.totalorder %s46_s24, %s46_s24 }
  0x16   :  { %v35_v9 = vadd.f32 %v31_v4, %v29_v6  ;;  %p84_p8 = scmp.ne.s32.totalorder %s46_s24, %s83_s0  ;;  %p89_p10 = scmp.lt.s32.totalorder %s83_s0, %s83_s0 }
  0x17   :  { %36 = vst [vmem:[#allocation5] sm:$0xff] %v32_v3  ;;  %37 = vst [vmem:[#allocation5 + $0x8] sm:$0xff] %v33_v7 }
  0x18   :  { %38 = vst [vmem:[#allocation5 + $0x10] sm:$0xff] %v34_v8  ;;  %39 = vst [vmem:[#allocation5 + $0x18] sm:$0xff] %v35_v9  ;;  %p90_p11 = por %p89_p10, %p88_p9 }
  0x1a   :  { %p91_p12 = pnand %p90_p11, %p84_p8 }
  0x1c   :  { %94 = shalt.err (!%p91_p12)
}
  0x1d   :  { %s95_s1 = scalar_lea.hbm %s166_s2, 512 }
  0x1e   :  { %p96_p13 = scmp.ne.s32.totalorder %s166_s2, %s95_s1  ;;  %p99_p0 = scmp.lt.u32.totalorder %s95_s1, %s166_s2 }
  0x20   :  { %p101_p1 = pnand %p99_p0, %p96_p13 }
  0x22   :  { %104 = shalt.err (!%p101_p1)
}
  0x23   :  { %51 = dma.vmem_to_hbm [thread:$0]  %s46_s24, 512, %s166_s2, [#allocation4], %s110_s19, %s110_s19, %s111_s20  }
  0x24   :  { %107 = dma.done.wait [#allocation4], 512  }
  0x25   :  { %108 = vsyncadd [#allocation4], 4294966784 }
  0x26   :  { %55 = vsyncpa [#allocation3], 1 }
  0x27   :  { %56 = vsyncpa [#allocation4], 1 }

</bundles_post_ra>
